<compile_context>
chip_gen: v7x
topology: tpu7x:2x2x1
jax: 0.10.0
libtpu: 0.0.40
codegen_flags: <defaults>
</compile_context>

<pallas_src>
import math

import jax
import jax.numpy as jnp
from jax.experimental import pallas as pl
from jax.experimental.pallas import tpu as pltpu

_SQRT_2_OVER_PI = math.sqrt(2.0 / math.pi)
_GELU_COEFF = 0.044715

_TARGET_TILE_BYTES = 2 * 1024 * 1024      # ~2 MiB per input tile (in+out double
                                          # buffered -> ~8 MiB VMEM, fits all gens)


def _gelu_formula_f32(x):
    """Pure-JAX tanh-approx GELU (reference + tiny ragged tails)."""
    xf = x.astype(jnp.float32)
    inner = _SQRT_2_OVER_PI * (xf + _GELU_COEFF * xf * xf * xf)
    return (0.5 * xf * (1.0 + jnp.tanh(inner))).astype(x.dtype)


def _gelu_kernel(x_ref, o_ref):
    """Elementwise tanh-approx GELU on one (tile_rows, lanes) slab."""
    # f32 compute is mandatory on v5e (no bf16 VPU/EUP) and cheap everywhere
    # else in a mem-bound kernel; tanh lowers to the EUP slot.
    # TODO(synk): if VALU ever binds on v7x for bf16 inputs, try packed-bf16
    # polynomial math (accuracy check required).
    x = x_ref[...].astype(jnp.float32)
    inner = _SQRT_2_OVER_PI * (x + _GELU_COEFF * x * x * x)
    o_ref[...] = (0.5 * x * (1.0 + jnp.tanh(inner))).astype(o_ref.dtype)


def _round_up(n: int, m: int) -> int:
    return ((n + m - 1) // m) * m


def _sublane_multiple(dtype) -> int:
    # Packed-sublane multiple: 8 for 32-bit, 16 for bf16/f16, 32 for 8-bit.
    return max(8, 32 // jnp.dtype(dtype).itemsize)


def _gelu_2d(x2d):
    """Run the GELU kernel over a (rows, lanes) array (lanes % 128 == 0)."""
    rows, lanes = x2d.shape
    dtype = x2d.dtype
    itemsize = jnp.dtype(dtype).itemsize
    sub = _sublane_multiple(dtype)

    # Row cap that keeps the per-tile byte size ~constant across dtypes.
    max_tile_rows = max(sub, _round_up(_TARGET_TILE_BYTES // (lanes * itemsize), sub))

    # Number of grid steps: enough to (a) keep tiles <= ~2 MiB and (b) give
    # v7x's two TensorCores at least two "parallel" steps when there is
    # enough data to split.
    num_tiles = pl.cdiv(rows, max_tile_rows)
    if num_tiles == 1 and rows >= 2 * sub:
        num_tiles = 2

    if num_tiles == 1:
        tile_rows = rows                       # full-array block: always legal
    else:
        # Near-exact tiling: any leftover rows in the final tile are masked by
        # Pallas (no input padding, <sub rows of masked work per call).
        tile_rows = _round_up(pl.cdiv(rows, num_tiles), sub)

    grid = (pl.cdiv(rows, tile_rows),)

    # VMEM budget: in + out, double-buffered, plus slack.  Explicit because
    # v5e's default scoped limit is only 16 MiB; never claim v7x's full 64 MiB.
    tile_bytes = tile_rows * lanes * itemsize
    vmem_limit = min(max(4 * tile_bytes + (2 << 20), 16 << 20), 32 << 20)

    return pl.pallas_call(
        _gelu_kernel,
        out_shape=jax.ShapeDtypeStruct((rows, lanes), dtype),
        grid=grid,
        in_specs=[pl.BlockSpec((tile_rows, lanes), lambda i: (i, 0))],
        out_specs=pl.BlockSpec((tile_rows, lanes), lambda i: (i, 0)),
        compiler_params=pltpu.CompilerParams(
            dimension_semantics=("parallel",),   # shard row tiles across TCs
            vmem_limit_bytes=vmem_limit,
        ),
    )(x2d)


def gelu(x):
    """Apply tanh-approx GELU to an array of any shape via a Pallas kernel."""
    orig_shape = x.shape
    total = x.size
    if total == 0:
        return x
    flat = x.reshape(-1)

    # Fast path: pick a lane width that divides the element count so the
    # (rows, lanes) view and the final reshape are metadata-only (zero copy).
    lanes = None
    for cand in (512, 256, 128):
        if total % cand == 0:
            lanes = cand
            break
    if lanes is not None:
        out2d = _gelu_2d(flat.reshape(total // lanes, lanes))
        return out2d.reshape(orig_shape)

    # Ragged path (element count not a multiple of 128): kernel on the aligned
    # prefix, plain-JAX formula on the tiny (<128 element) tail.
    aligned = (total // 128) * 128
    if aligned == 0:
        # Tiny tensor: not worth a kernel launch.
        return _gelu_formula_f32(flat).reshape(orig_shape)
    head_lanes = 128
    for cand in (512, 256, 128):
        if aligned % cand == 0:
            head_lanes = cand
            break
    head_out = _gelu_2d(flat[:aligned].reshape(aligned // head_lanes, head_lanes))
    tail_out = _gelu_formula_f32(flat[aligned:])
    return jnp.concatenate([head_out.reshape(-1), tail_out]).reshape(orig_shape)


class GELU:
    """JAX/Pallas port of the PyTorch GELU module (tanh approximation)."""

    def __init__(self):
        self._fn = jax.jit(gelu)

    def __call__(self, x):
        return self._fn(x)


if __name__ == "__main__":
    key = jax.random.PRNGKey(0)
    mod = GELU()

    # Primary test: small shape consistent with an elementwise activation
    # module (batch=2, channels=4, spatial=16x16) -> 2048 elems, lanes=512.
    x = jax.random.normal(key, (2, 4, 16, 16), jnp.float32)
    out = jax.block_until_ready(mod(x))
    ref = _gelu_formula_f32(x)
    assert out.shape == x.shape and out.dtype == x.dtype
    assert jnp.allclose(out, ref, atol=1e-5, rtol=1e-5)

    # Multi-tile path (rows=16 -> forced 2 grid steps for the 2-TC case).
    k1, k2, k3 = jax.random.split(key, 3)
    x2 = jax.random.normal(k1, (2, 8, 16, 32), jnp.float32)
    out2 = jax.block_until_ready(mod(x2))
    assert jnp.allclose(out2, _gelu_formula_f32(x2), atol=1e-5, rtol=1e-5)

    # bf16 path (sublane multiple 16).
    x3 = jax.random.normal(k2, (4, 8, 16, 16), jnp.float32).astype(jnp.bfloat16)
    out3 = jax.block_until_ready(mod(x3))
    assert jnp.allclose(out3.astype(jnp.float32),
                        _gelu_formula_f32(x3).astype(jnp.float32),
                        atol=5e-2, rtol=5e-2)

    # Ragged path (774 elems: aligned prefix kernel + tiny JAX tail).
    x4 = jax.random.normal(k3, (2, 3, 129), jnp.float32)
    out4 = jax.block_until_ready(mod(x4))
    assert jnp.allclose(out4, _gelu_formula_f32(x4), atol=1e-5, rtol=1e-5)

    print("KERNEL_OK")
</pallas_src>

<mosaic_0001>
module attributes {stable_mosaic.version = 11 : i64} {
  func.func @_gelu_kernel(%arg0: i32, %arg1: memref<4x512xf32, #tpu.memory_space<vmem>>, %arg2: memref<4x512xf32, #tpu.memory_space<vmem>>) attributes {dimension_semantics = [#tpu.dimension_semantics<parallel>], iteration_bounds = array<i64: 1>, scalar_prefetch = 0 : i64, scratch_operands = 0 : i64, tpu.core_type = #tpu.core_type<tc>, window_params = [{transform_indices = @transform_0, window_bounds = array<i64: 4, 512>}, {transform_indices = @transform_1, window_bounds = array<i64: 4, 512>}]} {
    %c0 = arith.constant 0 : index
    %c0_0 = arith.constant 0 : index
    %0 = vector.load %arg1[%c0, %c0_0] : memref<4x512xf32, #tpu.memory_space<vmem>>, vector<4x512xf32>
    %cst = arith.constant 4.471500e-02 : f32
    %1 = vector.broadcast %cst : f32 to vector<4x512xf32>
    %2 = arith.mulf %1, %0 : vector<4x512xf32>
    %3 = arith.mulf %2, %0 : vector<4x512xf32>
    %4 = arith.mulf %3, %0 : vector<4x512xf32>
    %5 = arith.addf %0, %4 : vector<4x512xf32>
    %cst_1 = arith.constant 0.797884583 : f32
    %6 = vector.broadcast %cst_1 : f32 to vector<4x512xf32>
    %7 = arith.mulf %6, %5 : vector<4x512xf32>
    %cst_2 = arith.constant 5.000000e-01 : f32
    %8 = vector.broadcast %cst_2 : f32 to vector<4x512xf32>
    %9 = arith.mulf %8, %0 : vector<4x512xf32>
    %10 = math.tanh %7 : vector<4x512xf32>
    %cst_3 = arith.constant 1.000000e+00 : f32
    %11 = vector.broadcast %cst_3 : f32 to vector<4x512xf32>
    %12 = arith.addf %11, %10 : vector<4x512xf32>
    %13 = arith.mulf %9, %12 : vector<4x512xf32>
    %c0_4 = arith.constant 0 : index
    %c0_5 = arith.constant 0 : index
    %14 = vector.load %arg2[%c0_4, %c0_5] : memref<4x512xf32, #tpu.memory_space<vmem>>, vector<4x512xf32>
    tpu.vector_store %arg2[%c0_4, %c0_5], %13 {strides = array<i32>} : memref<4x512xf32, #tpu.memory_space<vmem>>, vector<4x512xf32>,
    return
  }
  func.func @transform_0(%arg0: i32) -> (i32, i32) {
    %c0_i32 = arith.constant 0 : i32
    %c0_i32_0 = arith.constant 0 : i32
    return %arg0, %c0_i32 : i32, i32
  }
  func.func @transform_1(%arg0: i32) -> (i32, i32) {
    %c0_i32 = arith.constant 0 : i32
    %c0_i32_0 = arith.constant 0 : i32
    return %arg0, %c0_i32 : i32, i32
  }
}

</mosaic_0001>

<bundles_post_ra>
// kernel: gelu.1
= control target key start
LH: loop header
LB: loop body
LE: loop exit
PB: predicated region body
PF: predicated region fallthrough
CT: control target
= control target key end

     0   :  { %s60_s0 = inlined_call_operand.vmem [shape: f32[4,512], index: 0, kind: input, shape index: {}]   ;;  %s61_s1 = inlined_call_operand.vmem [shape: f32[4,512], index: 1, kind: output, shape index: {}]  }
   0x1   :  { %v8_v0 = vld [vmem:[%s60_s0] sm:$0xff]  ;;  %v9_v1 = vld [vmem:[%s60_s0 + $0x8] sm:$0xff] }
   0x2   :  { %v10_v2 = vmul.f32 0.044715, %v8_v0  ;;  %v11_v3 = vmul.f32 0.044715, %v9_v1  ;;  %v20_v12 = vmul.f32 0.5, %v8_v0  ;;  %v21_v14 = vmul.f32 0.5, %v9_v1 }
   0x4   :  { %v12_v4 = vmul.f32 %v10_v2, %v8_v0  ;;  %v13_v5 = vmul.f32 %v11_v3, %v9_v1 }
   0x6   :  { %v14_v6 = vmul.f32 %v12_v4, %v8_v0  ;;  %v15_v7 = vmul.f32 %v13_v5, %v9_v1 }
   0x8   :  { %v16_v8 = vadd.f32 %v14_v6, %v8_v0  ;;  %v17_v9 = vadd.f32 %v15_v7, %v9_v1 }
   0xa   :  { %v18_v10 = vmul.f32 0.7978846, %v16_v8  ;;  %v19_v11 = vmul.f32 0.7978846, %v17_v9 }
   0xc   :  { %34 = vtanh.f32 %v18_v10 }
   0xd   :  { %36 = vtanh.f32 %v19_v11 }
  0x16   :  { %v35_v13 = vpop.eup %34 }
  0x17   :  { %v37_v15 = vpop.eup %36  ;;  %v24_v16 = vadd.f32 1.0, %v35_v13 }
  0x18   :  { %v25_v17 = vadd.f32 1.0, %v37_v15 }
  0x19   :  { %v26_v18 = vmul.f32 %v24_v16, %v20_v12 }
  0x1a   :  { %v27_v19 = vmul.f32 %v25_v17, %v21_v14 }
  0x1b   :  { %28 = vst [vmem:[%s61_s1] sm:$0xff] %v26_v18 }
  0x1c   :  { %29 = vst [vmem:[%s61_s1 + $0x8] sm:$0xff] %v27_v19 }

</bundles_post_ra>
